<compile_context>
chip_gen: v7x
topology: tpu7x:2x2x1
jax: 0.10.0
libtpu: 0.0.40
codegen_flags: <defaults>
</compile_context>

<pallas_src>
import functools

import jax
import jax.numpy as jnp
from jax.experimental import pallas as pl
from jax.experimental.pallas import tpu as pltpu

_LANE = 128
_SUBLANE = 8
_PAD_BIAS = -1e30              # pad-class bias -> exp(s - m) == 0 in softmax
_TILE_N_MAX = 1024             # 512-1024 rows ~= 85-86% of HBM roofline
_HEADROOM = 16 * 1024 * 1024   # VMEM left for compiler-internal scratch
_SLACK = 2 * 1024 * 1024       # extra margin inside the tile-size solve


def _round_up(x, m):
    return (x + m - 1) // m * m


def _cdiv(a, b):
    return -(-a // b)


def _vmem_capacity_bytes():
    """Physical VMEM of this generation (64 MiB v7x / 128 MiB v5e-v6e)."""
    try:
        cap = int(getattr(pltpu.get_tpu_info(), "vmem_capacity_bytes", 0))
        if cap > 0:
            return cap
    except Exception:
        pass
    return 64 * 1024 * 1024    # conservative fallback (v7x per-TensorCore)


def _pick_tile_n(n, dim_in, dim_out_p, x_item, out_item, budget):
    """Row-tile size from the FULL per-step VMEM footprint:
       2x (tile_n, dim_in) x buffers + 2x (tile_n, dim_out_p) out buffers
       + resident W (Buffered(1)) + bias, inside `budget` bytes.
       Also minimizes row padding and guarantees >= 2 grid steps so the
       "parallel" axis actually splits across v7x's two TensorCores."""
    n8 = _round_up(max(n, 1), _SUBLANE)
    per_row = 2 * dim_in * x_item + 2 * dim_out_p * out_item
    resident = dim_in * dim_out_p * x_item + _SUBLANE * dim_out_p * 4
    avail = budget - resident - _SLACK
    # TODO(synk): if W alone blows the budget (huge dim_in*dim_out_p on v7x's
    # 64 MiB), add an innermost "arbitrary" K grid axis with an f32 scratch
    # accumulator instead of one fully resident W.
    avail = max(avail, per_row * _SUBLANE)
    tile_cap = max(_SUBLANE, min(_TILE_N_MAX, avail // per_row))
    tile_cap = (tile_cap // _SUBLANE) * _SUBLANE
    num_tiles = _cdiv(n8, tile_cap)
    if n8 >= 2 * _SUBLANE:               # v7x megacore: at least 2 row tiles
        num_tiles = max(num_tiles, 2)
    return _round_up(_cdiv(n8, num_tiles), _SUBLANE)


def _mil_kernel(x_ref, w_ref, b_ref, out_ref):
    # One MXU matmul, f32 accumulation regardless of operand dtype.
    s = jnp.dot(x_ref[...], w_ref[...], preferred_element_type=jnp.float32)
    s = s + b_ref[...]                   # f32 bias; pad classes carry -1e30
    # Row softmax (dim=1 of the torch module): max/sum are lane (XLU)
    # reductions; denominator reciprocal runs on the otherwise-idle EUP.
    m = jnp.max(s, axis=-1, keepdims=True)
    e = jnp.exp(s - m)
    # NOTE: approx reciprocal -> rows sum to 1 only to ~2^-12 relative error.
    p = e * pl.reciprocal(jnp.sum(e, axis=-1, keepdims=True), approx=True)
    out_ref[...] = p.astype(out_ref.dtype)


@functools.partial(
    jax.jit, static_argnames=("mxu_dtype", "out_dtype", "return_padded"))
def mil_outputs_forward(x, w0, b0, w1=None, b1=None, *,
                        mxu_dtype=jnp.bfloat16, out_dtype=None,
                        return_padded=False):
    """Forward of mil_outputs: softmax(x @ w0 + b0, axis=1).

    x : [N, dim_in] or [N, dim_in, 1, 1]
    w0: [dim_in, dim_out] (transposed torch Linear weight); b0: [dim_out]
    w1/b1: accepted for API compatibility; dead w.r.t. the returned value.
    mxu_dtype: MXU operand dtype (default bf16: halves x/W HBM bytes on all
      generations; the wrapper cast fuses away when the upstream producer is
      already bf16).  Accumulation, bias and softmax stay f32.  Pass
      jnp.float32 to opt out.
    out_dtype: output dtype (default: x's input dtype).
    return_padded: return the lane-padded [N, round_up(dim_out,128)] slab and
      skip the post-kernel column slice (saves a full re-read/re-write of the
      output when dim_out << 128 and the consumer tolerates zero pad columns).
    """
    del w1, b1                                   # dead branch in the forward
    if x.ndim == 4:
        x = x.squeeze(3).squeeze(2)
    n, dim_in = x.shape
    dim_out = w0.shape[1]
    out_dtype = x.dtype if out_dtype is None else out_dtype

    if n == 0:                                   # degenerate grid guard
        width = _round_up(dim_out, _LANE) if return_padded else dim_out
        return jnp.zeros((0, width), out_dtype)

    # Lane-dense classes: pad dim_out to a multiple of 128; pad columns get a
    # ~-inf bias so exp() of them is exactly 0 and the softmax is unchanged.
    dim_out_p = _round_up(dim_out, _LANE)
    # TODO(synk): tile/pad dim_out in 256s if this head ever becomes MXU-bound
    # (v6e/v7x MXUs are 256 wide); irrelevant while it stays HBM-bound.
    if dim_out_p == dim_out:
        w = w0
    else:
        w = jnp.zeros((dim_in, dim_out_p), w0.dtype).at[:, :dim_out].set(w0)
    b = (jnp.full((1, dim_out_p), _PAD_BIAS, jnp.float32)
         .at[0, :dim_out].set(b0.astype(jnp.float32)))

    if mxu_dtype is not None:
        if x.dtype != mxu_dtype:
            x = x.astype(mxu_dtype)
        if w.dtype != mxu_dtype:
            w = w.astype(mxu_dtype)

    # Per-generation VMEM budget minus headroom for compiler scratch:
    # v7x: 64 MiB -> ~48 MiB usable; v5e/v6e: 128 MiB -> ~112 MiB usable.
    budget = _vmem_capacity_bytes()
    budget = max(budget - _HEADROOM, budget // 2)

    x_item = jnp.dtype(x.dtype).itemsize
    out_item = jnp.dtype(out_dtype).itemsize
    tile_n = _pick_tile_n(n, dim_in, dim_out_p, x_item, out_item, budget)
    grid_n = _cdiv(n, tile_n)        # ragged last tile: no wrapper-side pad

    out = pl.pallas_call(
        _mil_kernel,
        out_shape=jax.ShapeDtypeStruct((n, dim_out_p), out_dtype),
        grid_spec=pltpu.PrefetchScalarGridSpec(
            num_scalar_prefetch=0,
            grid=(grid_n,),
            in_specs=[
                pl.BlockSpec((tile_n, dim_in), lambda i: (i, 0)),     # x tiles
                pl.BlockSpec((dim_in, dim_out_p), lambda i: (0, 0),   # W: resident,
                             pipeline_mode=pl.Buffered(1)),           # single buffer
                pl.BlockSpec((1, dim_out_p), lambda i: (0, 0),        # b: resident
                             pipeline_mode=pl.Buffered(1)),
            ],
            out_specs=pl.BlockSpec((tile_n, dim_out_p), lambda i: (i, 0)),
        ),
        compiler_params=pltpu.CompilerParams(
            dimension_semantics=("parallel",),     # megacore split on v7x
            vmem_limit_bytes=int(budget),          # per-generation, not flat
        ),
    )(x, w, b)

    if return_padded or dim_out_p == dim_out:
        return out
    return out[:, :dim_out]


def init_params(key, dim_in, dim_out, dtype=jnp.float32):
    # Matches torch _init_weights: normal(std=0.01) weights, zero biases.
    # Weights stored as [dim_in, dim_out] (transposed vs torch Linear).
    k0, k1 = jax.random.split(key)
    w0 = (0.01 * jax.random.normal(k0, (dim_in, dim_out))).astype(dtype)
    w1 = (0.01 * jax.random.normal(k1, (dim_in, dim_out))).astype(dtype)
    b0 = jnp.zeros((dim_out,), dtype)
    b1 = jnp.zeros((dim_out,), dtype)
    return w0, b0, w1, b1


def _reference(x, w0, b0):
    if x.ndim == 4:
        x = x.squeeze(3).squeeze(2)
    return jax.nn.softmax(x @ w0 + b0, axis=1)


if __name__ == "__main__":
    key = jax.random.PRNGKey(0)
    kx, kx2, kp = jax.random.split(key, 3)

    N, DIM_IN, DIM_OUT = 8, 32, 16
    # 4-D input (N, C, 1, 1) as produced by upstream RoI pooling heads.
    x = jax.random.normal(kx, (N, DIM_IN, 1, 1), dtype=jnp.float32)
    w0, b0, w1, b1 = init_params(kp, DIM_IN, DIM_OUT)
    ref = _reference(x, w0, b0)

    # Default path: bf16 MXU operands, f32 accumulation / bias / softmax.
    out = jax.block_until_ready(mil_outputs_forward(x, w0, b0, w1, b1))
    assert out.shape == (N, DIM_OUT) and out.dtype == jnp.float32
    assert jnp.allclose(out, ref, atol=1e-2, rtol=1e-2), "bf16 path mismatch"
    assert jnp.allclose(jnp.sum(out, axis=1), 1.0, atol=2e-3), "rows not normalized"

    # Full-f32 opt-out path: tight tolerance vs reference.
    out_f32 = jax.block_until_ready(
        mil_outputs_forward(x, w0, b0, w1, b1, mxu_dtype=jnp.float32))
    assert jnp.allclose(out_f32, ref, atol=1e-4, rtol=1e-3), "f32 path mismatch"

    # 2-D input with N not a multiple of 8: exercises the ragged last row
    # tile (no wrapper pad) and the >=2-step megacore grid.
    x2 = jax.random.normal(kx2, (13, DIM_IN), dtype=jnp.float32)
    out2 = jax.block_until_ready(mil_outputs_forward(x2, w0, b0, w1, b1))
    assert out2.shape == (13, DIM_OUT)
    assert jnp.allclose(out2, _reference(x2, w0, b0), atol=1e-2, rtol=1e-2)

    # Lane-padded output path (consumer accepts the [N, 128] slab directly).
    out_pad = jax.block_until_ready(
        mil_outputs_forward(x, w0, b0, w1, b1, return_padded=True))
    assert out_pad.shape == (N, 128)
    assert jnp.allclose(out_pad[:, :DIM_OUT], ref, atol=1e-2, rtol=1e-2)
    assert jnp.allclose(out_pad[:, DIM_OUT:], 0.0), "pad classes not zero"

    print("KERNEL_OK")
</pallas_src>

<mosaic_0001>
module attributes {stable_mosaic.version = 11 : i64} {
  func.func @_mil_kernel(%arg0: i32, %arg1: memref<8x32xbf16, #tpu.memory_space<vmem>>, %arg2: memref<32x128xbf16, #tpu.memory_space<vmem>>, %arg3: memref<1x128xf32, #tpu.memory_space<vmem>>, %arg4: memref<8x128xf32, #tpu.memory_space<vmem>>) attributes {dimension_semantics = [#tpu.dimension_semantics<parallel>], iteration_bounds = array<i64: 1>, scalar_prefetch = 0 : i64, scratch_operands = 0 : i64, tpu.core_type = #tpu.core_type<tc>, window_params = [{transform_indices = @transform_0, window_bounds = array<i64: 8, 32>}, {pipeline_mode = #tpu.pipeline_mode<synchronous>, transform_indices = @transform_1, window_bounds = array<i64: 32, 128>}, {pipeline_mode = #tpu.pipeline_mode<synchronous>, transform_indices = @transform_2, window_bounds = array<i64: 1, 128>}, {transform_indices = @transform_3, window_bounds = array<i64: 8, 128>}]} {
    %c0 = arith.constant 0 : index
    %c0_0 = arith.constant 0 : index
    %0 = vector.load %arg1[%c0, %c0_0] : memref<8x32xbf16, #tpu.memory_space<vmem>>, vector<8x32xbf16>
    %c0_1 = arith.constant 0 : index
    %c0_2 = arith.constant 0 : index
    %1 = vector.load %arg2[%c0_1, %c0_2] : memref<32x128xbf16, #tpu.memory_space<vmem>>, vector<32x128xbf16>
    %cst = arith.constant dense<0.000000e+00> : vector<8x128xf32>
    %2 = tpu.matmul %0, %1, %cst {dimension_numbers = #tpu.dot_dimension_numbers<[1], [0], [0], [1], [0, 0, 1, 1], [], []>} : vector<8x32xbf16>, vector<32x128xbf16>, vector<8x128xf32> -> vector<8x128xf32>
    %c0_3 = arith.constant 0 : index
    %c0_4 = arith.constant 0 : index
    %3 = vector.load %arg3[%c0_3, %c0_4] : memref<1x128xf32, #tpu.memory_space<vmem>>, vector<1x128xf32>
    %4 = vector.broadcast %3 : vector<1x128xf32> to vector<8x128xf32>
    %5 = arith.addf %2, %4 : vector<8x128xf32>
    %cst_5 = arith.constant dense<0xFF800000> : vector<8xf32>
    %6 = vector.multi_reduction <maximumf>, %5, %cst_5 [1] : vector<8x128xf32> to vector<8xf32>
    %7 = vector.shape_cast %6 : vector<8xf32> to vector<8x1xf32>
    %8 = vector.broadcast %7 : vector<8x1xf32> to vector<8x128xf32>
    %9 = arith.subf %5, %8 : vector<8x128xf32>
    %10 = math.exp %9 : vector<8x128xf32>
    %cst_6 = arith.constant dense<0.000000e+00> : vector<8xf32>
    %11 = vector.multi_reduction <add>, %10, %cst_6 [1] : vector<8x128xf32> to vector<8xf32>
    %12 = vector.shape_cast %11 : vector<8xf32> to vector<8x1xf32>
    %13 = tpu.reciprocal %12 {approx = true} : vector<8x1xf32> -> vector<8x1xf32>
    %14 = vector.broadcast %13 : vector<8x1xf32> to vector<8x128xf32>
    %15 = arith.mulf %10, %14 : vector<8x128xf32>
    %c0_7 = arith.constant 0 : index
    %c0_8 = arith.constant 0 : index
    %16 = vector.load %arg4[%c0_7, %c0_8] : memref<8x128xf32, #tpu.memory_space<vmem>>, vector<8x128xf32>
    tpu.vector_store %arg4[%c0_7, %c0_8], %15 {strides = array<i32>} : memref<8x128xf32, #tpu.memory_space<vmem>>, vector<8x128xf32>,
    return
  }
  func.func @transform_0(%arg0: i32) -> (i32, i32) {
    %c0_i32 = arith.constant 0 : i32
    %c0_i32_0 = arith.constant 0 : i32
    return %arg0, %c0_i32 : i32, i32
  }
  func.func @transform_1(%arg0: i32) -> (i32, i32) {
    %c0_i32 = arith.constant 0 : i32
    %c0_i32_0 = arith.constant 0 : i32
    %c0_i32_1 = arith.constant 0 : i32
    return %c0_i32, %c0_i32_0 : i32, i32
  }
  func.func @transform_2(%arg0: i32) -> (i32, i32) {
    %c0_i32 = arith.constant 0 : i32
    %c0_i32_0 = arith.constant 0 : i32
    %c0_i32_1 = arith.constant 0 : i32
    return %c0_i32, %c0_i32_0 : i32, i32
  }
  func.func @transform_3(%arg0: i32) -> (i32, i32) {
    %c0_i32 = arith.constant 0 : i32
    %c0_i32_0 = arith.constant 0 : i32
    return %arg0, %c0_i32 : i32, i32
  }
}

</mosaic_0001>

<bundles_post_ra>
// kernel: mil_outputs_forward.1
= control target key start
LH: loop header
LB: loop body
LE: loop exit
PB: predicated region body
PF: predicated region fallthrough
CT: control target
= control target key end

     0   :  { %v156_v1 = vmov 0.0   ;;  %vm157_vm0 = vmmov 0   ;;  %s203_s0 = inlined_call_operand.vmem [shape: bf16[8,32], index: 0, kind: input, shape index: {}]   ;;  %s204_s1 = inlined_call_operand.vmem [shape: bf16[32,128], index: 1, kind: input, shape index: {}]   ;;  %s205_s2 = inlined_call_operand.vmem [shape: f32[1,128], index: 2, kind: input, shape index: {}]   ;;  %s206_s3 = inlined_call_operand.hbm [shape: f32[8,128], index: 3, kind: output, shape index: {}]  }
   0x1   :  { %v126_v0 = vld [vmem:[%s204_s1] sm:$0xff]   ;;  %115 = vmatprep.subr.bf16.mxu0 %v156_v1  ;;  %v127_v2 = vld [vmem:[%s204_s1 + $0x8] sm:$0xff]   ;;  %119 = vmatprep.mubr.msk.bf16.mxu0 %vm157_vm0, %v156_v1 }
   0x2   :  { %116 = vmatpush3.bf16.msra.mxu0 %v126_v0 }
   0x3   :  { %117 = vmatprep.subr.bf16.mxu0 %v156_v1 }
   0x4   :  { %8 = vsyncpa [#allocation3], 0  ;;  %v16_v3 = vld [vmem:[%s203_s0] sm:$0xf]  ;;  %vm40_vm1 = vcmask 261120   ;;  %s158_s0 = smov [#allocation2]  }
   0x5   :  { %v108_v4 = vld [vmem:[%s205_s2] ss:$0 sm:$0xff]  ;;  %s100_s1 = sshll.u32 %s158_s0, 4  ;;  %s101_s1 = int_to_ptr.vmem [resolvable:$true] %s100_s1 }
   0x6   :  { %118 = vmatpush3.bf16.msra.mxu0 %v127_v2  ;;  %s132_s2 = scalar_lea.vmem %s101_s1, 128  ;;  %p137_p1 = scmp.lt.s32.totalorder %s101_s1, %s101_s1 }
   0x7   :  { %p133_p0 = scmp.ne.s32.totalorder %s101_s1, %s132_s2  ;;  %p138_p2 = scmp.lt.s32.totalorder %s132_s2, %s132_s2 }
   0x9   :  { %120 = vmatmul.mubr.msk.bf16.vlgmr.msra.gmra.mrb[0].mxu0 %vm40_vm1, %v16_v3  ;;  %p139_p3 = por %p138_p2, %p137_p1 }
   0xb   :  { %p140_p4 = pnand %p139_p3, %p133_p0 }
  0xdc   :  { %v78_v5 = vpop.f32.mrb[0].mxu0 }
  0xdd   :  { %v79_v6 = vadd.f32 %v108_v4, %v78_v5  ;;  %v121_v7 = vpop.f32.mrb[1].mxu0 }
  0xde   :  { %v81_v8 = vpop.f32.mrb[2].mxu0 }
  0xdf   :  { %84 = vmax.xlane.f32.xlu0 %v79_v6  ;;  %v122_v9 = vpop.f32.mrb[3].mxu0 }
 0x16c   :  { %v85_v10 = vpop.xlane.xlu0 %84 }
 0x16d   :  { %v86_v11 = vsub.f32 %v79_v6, %v85_v10 }
 0x16f   :  { %v87_v12 = vmul.f32 1.442695, %v86_v11 }
 0x171   :  { %128 = vpow2.f32 %v87_v12 }
 0x17b   :  { %v129_v13 = vpop.eup %128 }
 0x17c   :  { %89 = vadd.xlane.f32.xlu0 %v129_v13 }
 0x209   :  { %v90_v14 = vpop.xlane.xlu0 %89 }
 0x20a   :  { %130 = vrcp.f32 %v90_v14 }
 0x214   :  { %v131_v15 = vpop.eup %130 }
 0x215   :  { %v92_v16 = vmul.f32 %v131_v15, %v129_v13 }
 0x217   :  { %93 = vst [vmem:[#allocation2] sm:$0xff] %v92_v16 }
 0x218   :  { %143 = shalt.err (!%p140_p4)
}
 0x219   :  { %s144_s22 = scalar_lea.hbm %s206_s3, 128 }
 0x21a   :  { %p145_p5 = scmp.ne.s32.totalorder %s206_s3, %s144_s22  ;;  %p148_p6 = scmp.lt.u32.totalorder %s144_s22, %s206_s3 }
 0x21c   :  { %p150_p7 = pnand %p148_p6, %p145_p5 }
 0x21e   :  { %153 = shalt.err (!%p150_p7)
}
 0x21f   :  { %103 = dma.vmem_to_hbm [thread:$0]  %s101_s1, 128, %s206_s3, [#allocation3]  }
 0x220   :  { %154 = dma.done.wait [#allocation3], 128  }
 0x221   :  { %155 = vsyncadd [#allocation3], 4294967168 }
 0x222   :  { %107 = vsyncpa [#allocation3], 1 }

</bundles_post_ra>
